<compile_context>
chip_gen: v7x
topology: tpu7x:2x2x1
jax: 0.10.0
libtpu: 0.0.40
codegen_flags: <defaults>
</compile_context>

<pallas_src>
import jax
import jax.numpy as jnp
from jax.experimental import pallas as pl
from jax.experimental.pallas import tpu as pltpu


def embeddings_kernel(tok_ref, w_ref, pe_ref, out_ref):
    # tok_ref: (Bb, Ntok, K) bf16 -- row 0 of every image is the zero row
    #          standing in for the class token.
    # w_ref:   (K, D) bf16 conv weight laid out (K, D).
    # pe_ref:  (Ntok, D) f32 folded table (cls + bias + positional enc.).
    # out_ref: (Bb, Ntok, D) output block.
    w = w_ref[...]
    pe = pe_ref[...]
    Bb = tok_ref.shape[0]
    for b in range(Bb):  # static unroll; Bb is capped small in the wrapper
        acc = jnp.dot(tok_ref[b], w, preferred_element_type=jnp.float32)  # MXU
        out_ref[b] = (acc + pe).astype(out_ref.dtype)                     # VPU


def make_positional_encoding(d_model, len_max):
    # Mirrors PositionalEncoding1D.__init__ (after the final permute):
    # pe[l, 2i] = sin(l * exp(-2i/dim * ln(1e4))),  pe[l, 2i+1] = cos(...)
    half = jnp.arange(0, d_model, 2, dtype=jnp.float32)
    div = jnp.exp(-half / d_model * jnp.log(jnp.float32(10000.0)))  # (D/2,)
    pos = jnp.arange(len_max, dtype=jnp.float32)                    # (L,)
    ang = pos[:, None] * div[None, :]                               # (L, D/2)
    pe = jnp.zeros((len_max, d_model), jnp.float32)
    pe = pe.at[:, 0::2].set(jnp.sin(ang))
    pe = pe.at[:, 1::2].set(jnp.cos(ang))
    return pe


def prepare_embedding_params(conv_w, conv_b, cls_token, pe):
    """Init-time preprocessing (hoisted out of the per-call path).

    Returns:
      w_mat:     (K, D) bf16 conv weight, (c, kh, kw)-major contraction axis.
      pe_folded: (len_max, D) f32; row 0 = cls + pe[0], rows 1.. = bias + pe.
    """
    D, C, Ph, Pw = conv_w.shape
    K = C * Ph * Pw
    w_mat = conv_w.reshape(D, K).T.astype(jnp.bfloat16)            # (K, D)
    pe_f = pe.astype(jnp.float32)                                  # (L, D)
    row0 = cls_token.reshape(1, D).astype(jnp.float32) + pe_f[0:1]  # no bias
    rest = pe_f[1:] + conv_b.astype(jnp.float32)[None, :]
    pe_folded = jnp.concatenate([row0, rest], axis=0)              # (L, D)
    return w_mat, pe_folded


def embeddings_forward(x, w_mat, pe_folded, patch_size, out_dtype=None):
    B, C, H, W = x.shape
    Ph, Pw = patch_size
    Hp, Wp = H // Ph, W // Pw
    N = Hp * Wp
    K, D = w_mat.shape
    assert K == C * Ph * Pw, "conv weight does not match input channels/patch"
    ntok = N + 1
    assert ntok <= pe_folded.shape[0], "image exceeds max_img_size (PE table)"
    out_dtype = x.dtype if out_dtype is None else out_dtype

    # im2col in (c, kh, kw) order (matches OIHW weight flatten), bf16 cast,
    # and one zero cls row prepended -- a single fused transpose/pad/cast.
    patches = x.reshape(B, C, Hp, Ph, Wp, Pw)
    patches = patches.transpose(0, 2, 4, 1, 3, 5).reshape(B, N, K)
    tok = jnp.pad(patches.astype(jnp.bfloat16), ((0, 0), (1, 0), (0, 0)))

    pe_tab = pe_folded[:ntok]                                      # (Ntok, D)

    # ---- generation-aware batch-tile sizing -------------------------------
    try:
        vmem_cap = pltpu.get_tpu_info().vmem_capacity_bytes
    except Exception:
        vmem_cap = 64 * 1024 * 1024            # conservative (v7x per-core)
    try:
        kind = jax.devices()[0].device_kind.lower()
    except Exception:
        kind = ""
    num_cores = 2 if "v7" in kind else 1       # only v7x has 2 TCs per chip

    vmem_limit = int(min(vmem_cap * 3 // 4, 96 * 1024 * 1024))
    budget = vmem_limit // 2                   # headroom for compiler scratch

    out_elt = jnp.dtype(out_dtype).itemsize
    per_img = 2 * ntok * K * 2 + 2 * ntok * D * out_elt   # double-buffered blocks
    const = 2 * (K * D * 2 + ntok * D * 4)                # resident w + pe
    bb_vmem = max(1, (budget - const) // per_img)
    bb_rows = max(1, 2048 // ntok)             # ~1-2K MXU rows per grid step
    Bb = int(max(1, min(B, bb_vmem, bb_rows, 32)))
    if num_cores >= 2 and B >= 2:
        # keep >= 2 parallel grid steps so both v7x TensorCores get work;
        # single-TC chips (v5e/v6e) take the largest block instead.
        Bb = min(Bb, pl.cdiv(B, 2))
    grid = pl.cdiv(B, Bb)                      # boundary block clipped by Pallas

    out = pl.pallas_call(
        embeddings_kernel,
        out_shape=jax.ShapeDtypeStruct((B, ntok, D), out_dtype),
        grid_spec=pltpu.PrefetchScalarGridSpec(
            num_scalar_prefetch=0,
            grid=(grid,),
            in_specs=[
                # last-two block dims equal the full array dims -> exempt from
                # the (8,128) divisibility rule, no padding needed.
                pl.BlockSpec((Bb, ntok, K), lambda b: (b, 0, 0)),
                pl.BlockSpec((K, D), lambda b: (0, 0)),
                pl.BlockSpec((ntok, D), lambda b: (0, 0)),
            ],
            out_specs=pl.BlockSpec((Bb, ntok, D), lambda b: (b, 0, 0)),
        ),
        compiler_params=pltpu.CompilerParams(
            dimension_semantics=("parallel",),
            vmem_limit_bytes=vmem_limit,
            # let XLA fold the im2col/pad/cast producer of `tok` into the
            # pallas prologue (effective when this forward is jitted).
            allow_input_fusion=[True, False, False],
        ),
    )(tok, w_mat, pe_tab)
    return out


if __name__ == "__main__":
    # Small shapes consistent with the module.
    B, C, H, W = 2, 4, 16, 16
    patch_size = (4, 4)
    d_model = 32
    max_img_size = (16, 16)
    max_num_patches = (max_img_size[0] // patch_size[0]) * (
        max_img_size[1] // patch_size[1]) + 1          # = 17

    key = jax.random.PRNGKey(0)
    kx, kw, kb = jax.random.split(key, 3)
    x = jax.random.normal(kx, (B, C, H, W), jnp.float32)
    # Deterministic synthetic parameters (shapes from the module's __init__):
    conv_w = jax.random.normal(
        kw, (d_model, C, patch_size[0], patch_size[1]), jnp.float32) * 0.05
    conv_b = jax.random.normal(kb, (d_model,), jnp.float32) * 0.05
    cls_token = jnp.zeros((1, 1, d_model), jnp.float32)  # nn.Parameter(zeros)
    pe = make_positional_encoding(d_model, max_num_patches)

    # Hoisted (init-time) parameter preprocessing.
    w_mat, pe_folded = prepare_embedding_params(conv_w, conv_b, cls_token, pe)

    out = embeddings_forward(x, w_mat, pe_folded, patch_size)
    out = jax.block_until_ready(out)

    # Pure-JAX f32 reference (conv -> flatten -> transpose -> cat cls -> +pe).
    ref_conv = jax.lax.conv_general_dilated(
        x, conv_w, window_strides=patch_size, padding="VALID",
        dimension_numbers=("NCHW", "OIHW", "NCHW")) + conv_b[None, :, None, None]
    N = ref_conv.shape[2] * ref_conv.shape[3]
    ref_tokens = ref_conv.reshape(B, d_model, N).transpose(0, 2, 1)
    ref = jnp.concatenate(
        [jnp.broadcast_to(cls_token, (B, 1, d_model)), ref_tokens], axis=1)
    ref = ref + pe[None, : N + 1, :]

    assert out.shape == (B, N + 1, d_model)
    # Tolerance accounts for the bf16 cast of patches/weights (f32 accumulate).
    assert jnp.allclose(out, ref, atol=3e-2, rtol=3e-2), float(
        jnp.max(jnp.abs(out - ref)))

    print("KERNEL_OK")
</pallas_src>

<mosaic_0001>
module attributes {stable_mosaic.version = 11 : i64} {
  func.func @embeddings_kernel(%arg0: i32, %arg1: memref<2x17x64xbf16, #tpu.memory_space<vmem>>, %arg2: memref<64x32xbf16, #tpu.memory_space<vmem>>, %arg3: memref<17x32xf32, #tpu.memory_space<vmem>>, %arg4: memref<2x17x32xf32, #tpu.memory_space<vmem>>) attributes {dimension_semantics = [#tpu.dimension_semantics<parallel>], iteration_bounds = array<i64: 1>, scalar_prefetch = 0 : i64, scratch_operands = 0 : i64, tpu.core_type = #tpu.core_type<tc>, window_params = [{transform_indices = @transform_0, window_bounds = array<i64: 2, 17, 64>}, {pipeline_mode = #tpu.pipeline_mode<synchronous>, transform_indices = @transform_1, window_bounds = array<i64: 64, 32>}, {pipeline_mode = #tpu.pipeline_mode<synchronous>, transform_indices = @transform_2, window_bounds = array<i64: 17, 32>}, {transform_indices = @transform_3, window_bounds = array<i64: 2, 17, 32>}]} {
    %c0 = arith.constant 0 : index
    %c0_0 = arith.constant 0 : index
    %0 = vector.load %arg2[%c0, %c0_0] : memref<64x32xbf16, #tpu.memory_space<vmem>>, vector<64x32xbf16>
    %c0_1 = arith.constant 0 : index
    %c0_2 = arith.constant 0 : index
    %1 = vector.load %arg3[%c0_1, %c0_2] : memref<17x32xf32, #tpu.memory_space<vmem>>, vector<17x32xf32>
    %c0_3 = arith.constant 0 : index
    %c0_4 = arith.constant 0 : index
    %c0_5 = arith.constant 0 : index
    %2 = vector.load %arg1[%c0_3, %c0_4, %c0_5] : memref<2x17x64xbf16, #tpu.memory_space<vmem>>, vector<1x17x64xbf16>
    %3 = vector.shape_cast %2 : vector<1x17x64xbf16> to vector<17x64xbf16>
    %cst = arith.constant dense<0.000000e+00> : vector<17x32xf32>
    %4 = tpu.matmul %3, %0, %cst {dimension_numbers = #tpu.dot_dimension_numbers<[1], [0], [0], [1], [0, 0, 1, 1], [], []>} : vector<17x64xbf16>, vector<64x32xbf16>, vector<17x32xf32> -> vector<17x32xf32>
    %5 = arith.addf %4, %1 : vector<17x32xf32>
    %c0_6 = arith.constant 0 : index
    %c0_7 = arith.constant 0 : index
    %c0_8 = arith.constant 0 : index
    %6 = vector.load %arg4[%c0_6, %c0_7, %c0_8] : memref<2x17x32xf32, #tpu.memory_space<vmem>>, vector<1x17x32xf32>
    %7 = vector.shape_cast %6 : vector<1x17x32xf32> to vector<17x32xf32>
    %8 = vector.shape_cast %5 : vector<17x32xf32> to vector<1x17x32xf32>
    tpu.vector_store %arg4[%c0_6, %c0_7, %c0_8], %8 {strides = array<i32>} : memref<2x17x32xf32, #tpu.memory_space<vmem>>, vector<1x17x32xf32>,
    %c1 = arith.constant 1 : index
    %c0_9 = arith.constant 0 : index
    %c0_10 = arith.constant 0 : index
    %9 = vector.load %arg1[%c1, %c0_9, %c0_10] : memref<2x17x64xbf16, #tpu.memory_space<vmem>>, vector<1x17x64xbf16>
    %10 = vector.shape_cast %9 : vector<1x17x64xbf16> to vector<17x64xbf16>
    %cst_11 = arith.constant dense<0.000000e+00> : vector<17x32xf32>
    %11 = tpu.matmul %10, %0, %cst_11 {dimension_numbers = #tpu.dot_dimension_numbers<[1], [0], [0], [1], [0, 0, 1, 1], [], []>} : vector<17x64xbf16>, vector<64x32xbf16>, vector<17x32xf32> -> vector<17x32xf32>
    %12 = arith.addf %11, %1 : vector<17x32xf32>
    %c1_12 = arith.constant 1 : index
    %c0_13 = arith.constant 0 : index
    %c0_14 = arith.constant 0 : index
    %13 = vector.load %arg4[%c1_12, %c0_13, %c0_14] : memref<2x17x32xf32, #tpu.memory_space<vmem>>, vector<1x17x32xf32>
    %14 = vector.shape_cast %13 : vector<1x17x32xf32> to vector<17x32xf32>
    %15 = vector.shape_cast %12 : vector<17x32xf32> to vector<1x17x32xf32>
    tpu.vector_store %arg4[%c1_12, %c0_13, %c0_14], %15 {strides = array<i32>} : memref<2x17x32xf32, #tpu.memory_space<vmem>>, vector<1x17x32xf32>,
    return
  }
  func.func @transform_0(%arg0: i32) -> (i32, i32, i32) {
    %c0_i32 = arith.constant 0 : i32
    %c0_i32_0 = arith.constant 0 : i32
    %c0_i32_1 = arith.constant 0 : i32
    return %arg0, %c0_i32, %c0_i32_0 : i32, i32, i32
  }
  func.func @transform_1(%arg0: i32) -> (i32, i32) {
    %c0_i32 = arith.constant 0 : i32
    %c0_i32_0 = arith.constant 0 : i32
    %c0_i32_1 = arith.constant 0 : i32
    return %c0_i32, %c0_i32_0 : i32, i32
  }
  func.func @transform_2(%arg0: i32) -> (i32, i32) {
    %c0_i32 = arith.constant 0 : i32
    %c0_i32_0 = arith.constant 0 : i32
    %c0_i32_1 = arith.constant 0 : i32
    return %c0_i32, %c0_i32_0 : i32, i32
  }
  func.func @transform_3(%arg0: i32) -> (i32, i32, i32) {
    %c0_i32 = arith.constant 0 : i32
    %c0_i32_0 = arith.constant 0 : i32
    %c0_i32_1 = arith.constant 0 : i32
    return %arg0, %c0_i32, %c0_i32_0 : i32, i32, i32
  }
}

</mosaic_0001>

<bundles_post_ra>
// kernel: tpu_custom_call.1
= control target key start
LH: loop header
LB: loop body
LE: loop exit
PB: predicated region body
PF: predicated region fallthrough
CT: control target
= control target key end

     0   :  { %vm61_vm0 = vcmask 523264   ;;  %vm119_vm1 = vcmask 253952   ;;  %vm116_vm2 = vcmask 261120   ;;  %s336_s1 = inlined_call_operand.vmem [shape: bf16[64,32], index: 1, kind: input, shape index: {}]   ;;  %s337_s0 = inlined_call_operand.vmem [shape: bf16[2,17,64], index: 0, kind: input, shape index: {}]   ;;  %s338_s2 = inlined_call_operand.vmem [shape: f32[17,32], index: 2, kind: input, shape index: {}]   ;;  %s339_s3 = inlined_call_operand.vmem [shape: f32[2,17,32], index: 3, kind: output, shape index: {}]  }
   0x1   :  { %v249_v0 = vld [vmem:[%s336_s1] sm:$0xff]   ;;  %v250_v1 = vld [vmem:[%s336_s1 + $0x8] sm:$0xff]   ;;  %v251_v2 = vld [vmem:[%s336_s1 + $0x10] sm:$0xff]  }
   0x2   :  { %225 = vmatprep.subr.bf16.mxu0 %v249_v0  ;;  %237 = vmatprep.subr.bf16.mxu1 %v249_v0  ;;  %v253_v3 = vld [vmem:[%s337_s0] sm:$0xff]   ;;  %v254_v4 = vld [vmem:[%s337_s0 + $0xc] sm:$0xff]   ;;  %v252_v5 = vld [vmem:[%s336_s1 + $0x18] sm:$0xff]  }
   0x3   :  { %226 = vmatpush3.bf16.msra.mxu0 %v249_v0  ;;  %238 = vmatpush3.bf16.msra.mxu1 %v249_v0  ;;  %v255_v6 = vld [vmem:[%s337_s0 + $0x8] ss:$0 sps:$4 sm:$0x11]   ;;  %v256_v7 = vld [vmem:[%s337_s0 + $0x14] ss:$0 sps:$4 sm:$0x11]  }
   0x4   :  { %227 = vmatprep.subr.bf16.mxu0 %v250_v1  ;;  %239 = vmatprep.subr.bf16.mxu1 %v250_v1  ;;  %v25_v8 = vld [vmem:[%s338_s2 + $0x10] sm:$0x1]  ;;  %v23_v9 = vld [vmem:[%s338_s2] sm:$0xff]  ;;  %v24_v16 = vld [vmem:[%s338_s2 + $0x8] sm:$0xff] }
   0x5   :  { %233 = vmatprep.mubr.msk.bf16.mxu0 %vm61_vm0, %v253_v3  ;;  %245 = vmatprep.mubr.msk.bf16.mxu1 %vm61_vm0, %v254_v4 }
   0x7   :  { %228 = vmatpush3.bf16.msra.mxu0 %v250_v1  ;;  %240 = vmatpush3.bf16.msra.mxu1 %v250_v1 }
   0x8   :  { %229 = vmatprep.subr.bf16.mxu0 %v251_v2  ;;  %241 = vmatprep.subr.bf16.mxu1 %v251_v2 }
   0xb   :  { %230 = vmatpush3.bf16.msra.mxu0 %v251_v2  ;;  %242 = vmatpush3.bf16.msra.mxu1 %v251_v2 }
   0xc   :  { %231 = vmatprep.subr.bf16.mxu0 %v252_v5  ;;  %243 = vmatprep.subr.bf16.mxu1 %v252_v5 }
   0xf   :  { %232 = vmatpush3.bf16.msra.mxu0 %v252_v5  ;;  %244 = vmatpush3.bf16.msra.mxu1 %v252_v5 }
  0x12   :  { %234 = vmatmul.mubr.msk.bf16.vlgmr.msra.gmra.mrb[0].mxu0 %vm61_vm0, %v255_v6  ;;  %246 = vmatmul.mubr.msk.bf16.vlgmr.msra.gmra.mrb[0].mxu1 %vm61_vm0, %v256_v7 }
  0xe5   :  { %v235_v10 = vpop.f32.mrb[0].mxu0  ;;  %v247_v11 = vpop.f32.mrb[0].mxu1 }
  0xe6   :  { %v111_v12 = vadd.f32 %v235_v10, %v25_v8  ;;  %v182_v13 = vadd.f32 %v247_v11, %v25_v8  ;;  %v102_v14 = vpop.f32.mrb[1].mxu0  ;;  %v173_v15 = vpop.f32.mrb[1].mxu1 }
  0xe7   :  { %v103_v17 = vadd.f32 %v102_v14, %v23_v9  ;;  %v174_v18 = vadd.f32 %v173_v15, %v23_v9  ;;  %v236_v19 = vpop.f32.mrb[2].mxu0  ;;  %v248_v20 = vpop.f32.mrb[2].mxu1 }
  0xe8   :  { %120 = vst.msk [vmem:[%s339_s3 + $0x10] sm:$0x1] %vm119_vm1, %v111_v12  ;;  %212 = vst.msk [vmem:[%s339_s3 + $0x28] sm:$0x1] %vm119_vm1, %v182_v13  ;;  %v105_v21 = vpop.f32.mrb[3].mxu0  ;;  %v176_v22 = vpop.f32.mrb[3].mxu1 }
  0xe9   :  { %117 = vst.msk [vmem:[%s339_s3] sm:$0xff] %vm116_vm2, %v103_v17  ;;  %210 = vst.msk [vmem:[%s339_s3 + $0x18] sm:$0xff] %vm116_vm2, %v174_v18  ;;  %v106_v23 = vadd.f32 %v105_v21, %v24_v16  ;;  %v177_v24 = vadd.f32 %v176_v22, %v24_v16 }
  0xeb   :  { %118 = vst.msk [vmem:[%s339_s3 + $0x8] sm:$0xff] %vm116_vm2, %v106_v23  ;;  %211 = vst.msk [vmem:[%s339_s3 + $0x20] sm:$0xff] %vm116_vm2, %v177_v24 }

</bundles_post_ra>
